<compile_context>
chip_gen: v5e
topology: v5e:2x2
jax: 0.10.0
libtpu: 0.0.40
codegen_flags: <defaults>
</compile_context>

<pallas_src>
import jax
import jax.numpy as jnp
from jax.experimental import pallas as pl
from jax.experimental.pallas import tpu as pltpu


def mlp_kernel(x_ref, w1_ref, bh_ref, wh_ref, wo_ref, bo_ref, o_ref):
    """Fused MLP forward for one batch tile (batch-major, f32 accumulation).

    x_ref : (tile_b, in_dim)   input tile
    w1_ref: (in_dim, H)        first-layer weight, pre-transposed to (in, out)
    bh_ref: (depth, H)         hidden biases, row l = bias of hidden layer l
    wh_ref: (depth-1, H, H)    stacked hidden->hidden weights, pre-transposed to (in, out)
    wo_ref: (H, out_dim)       output weight, pre-transposed to (in, out)
    bo_ref: (1, out_dim)       output bias
    o_ref : (tile_b, out_dim)  output tile (batch-major; 2-wide masked store is accepted)
    """
    depth = bh_ref.shape[0]
    h = jnp.dot(x_ref[...], w1_ref[...], preferred_element_type=jnp.float32)
    h = jnp.tanh(h + bh_ref[0:1, :])
    for l in range(1, depth):
        h = jnp.dot(h, wh_ref[l - 1], preferred_element_type=jnp.float32)
        h = jnp.tanh(h + bh_ref[l:l + 1, :])
    out = jnp.dot(h, wo_ref[...], preferred_element_type=jnp.float32) + bo_ref[...]
    o_ref[...] = out.astype(o_ref.dtype)


def _tensorcores_per_chip():
    """Best-effort TensorCore count per chip (v5e/v6e -> 1, v7x -> 2). Defaults to 1."""
    try:
        info = pltpu.get_tpu_info()
        for name in ("num_cores", "cores_per_chip", "tensor_cores_per_chip", "num_tensorcores"):
            v = getattr(info, name, None)
            if isinstance(v, int) and v > 0:
                return v
    except Exception:
        pass
    try:
        kind = jax.devices()[0].device_kind.lower()
        if "v7" in kind:
            return 2
    except Exception:
        pass
    return 1


def pack_params(params):
    """One-time packing, hoisted out of the per-call path (perf-review item 1).

    Pre-transposes all weights to (in, out) layout and stacks the hidden weights/biases so a
    forward call is a single pallas_call with 6 operands and zero per-call stack/reshape HLO ops.
    params: list of (W, b) in PyTorch (out, in) layout.
    """
    depth = len(params) - 1
    assert depth >= 2, "kernel packing assumes at least 2 hidden layers"
    w1_t = jnp.asarray(params[0][0]).T                                        # (in_dim, H)
    wh_t = jnp.stack([jnp.asarray(params[l][0]).T for l in range(1, depth)])  # (depth-1, H, H)
    bh = jnp.stack([jnp.asarray(params[l][1]) for l in range(depth)])         # (depth, H)
    wo_t = jnp.asarray(params[-1][0]).T                                       # (H, out_dim)
    bo = jnp.asarray(params[-1][1]).reshape(1, -1)                            # (1, out_dim)
    return (w1_t, bh, wh_t, wo_t, bo)


def mlp_forward(x, packed, *, tile_b=256, num_cores=None):
    """x: (B, input_dim) float32.  packed: output of pack_params()."""
    w1_t, bh, wh_t, wo_t, bo = packed
    B, in_dim = x.shape
    H = w1_t.shape[1]
    depth = bh.shape[0]
    out_dim = wo_t.shape[1]

    if num_cores is None:
        num_cores = _tensorcores_per_chip()

    # ---- choose the batch tile ----------------------------------------------------------
    # This kernel is overhead-dominated: one grid step on single-TC chips; >= num_cores
    # "parallel" steps only when a multi-TC chip is present and B is big enough to split.
    tile_b = min(tile_b, B)
    if num_cores > 1 and B >= 16:
        per_core = max(8, (pl.cdiv(B, num_cores) // 8) * 8)
        tile_b = min(tile_b, per_core)
    if tile_b < B:
        tile_b = max(8, (tile_b // 8) * 8)          # sublane-aligned partial tiles
    n_tiles = pl.cdiv(B, tile_b)
    B_pad = n_tiles * tile_b
    x_in = x if B_pad == B else jnp.pad(x, ((0, B_pad - B), (0, 0)))

    # ---- specs ---------------------------------------------------------------------------
    def const_spec(arr):
        nd = arr.ndim
        # Constant index_map: the operand is DMA'd once and stays resident across grid steps.
        return pl.BlockSpec(arr.shape, lambda i, _nd=nd: (0,) * _nd)

    grid_spec = pltpu.PrefetchScalarGridSpec(
        num_scalar_prefetch=0,
        grid=(n_tiles,),
        in_specs=[
            pl.BlockSpec((tile_b, in_dim), lambda i: (i, 0)),   # batch-major x tile
            const_spec(w1_t), const_spec(bh), const_spec(wh_t),
            const_spec(wo_t), const_spec(bo),
        ],
        out_specs=pl.BlockSpec((tile_b, out_dim), lambda i: (i, 0)),
    )

    flops = 2 * B_pad * (in_dim * H + (depth - 1) * H * H + H * out_dim)
    transcendentals = depth * H * B_pad
    param_bytes = sum(int(a.size) * a.dtype.itemsize for a in packed)
    bytes_accessed = B_pad * (in_dim + out_dim) * x.dtype.itemsize + param_bytes

    out = pl.pallas_call(
        mlp_kernel,
        out_shape=jax.ShapeDtypeStruct((B_pad, out_dim), x.dtype),
        grid_spec=grid_spec,
        compiler_params=pltpu.CompilerParams(
            dimension_semantics=("parallel",)),
        cost_estimate=pl.CostEstimate(
            flops=int(flops),
            transcendentals=int(transcendentals),
            bytes_accessed=int(bytes_accessed)),
    )(x_in, w1_t, bh, wh_t, wo_t, bo)

    return out if B_pad == B else out[:B]


def init_params(key, input_dim=4, hidden_dim=64, output_dim=2, depth=4):
    """Xavier-normal weights in PyTorch (out, in) layout, zero biases (matches _initialize_weights)."""
    dims = [input_dim] + [hidden_dim] * depth + [output_dim]
    params = []
    for i in range(len(dims) - 1):
        key, sub = jax.random.split(key)
        fan_in, fan_out = dims[i], dims[i + 1]
        std = (2.0 / (fan_in + fan_out)) ** 0.5
        w = std * jax.random.normal(sub, (fan_out, fan_in), dtype=jnp.float32)
        b = jnp.zeros((fan_out,), dtype=jnp.float32)
        params.append((w, b))
    return params


def mlp_reference(x, params):
    h = x
    for (w, b) in params[:-1]:
        h = jnp.tanh(h @ w.T + b)
    w, b = params[-1]
    return h @ w.T + b


if __name__ == "__main__":
    key = jax.random.PRNGKey(0)
    k_x, k_p = jax.random.split(key)

    B, INPUT_DIM, HIDDEN_DIM, OUTPUT_DIM, DEPTH = 256, 4, 64, 2, 4
    x = jax.random.normal(k_x, (B, INPUT_DIM), dtype=jnp.float32)
    params = init_params(k_p, INPUT_DIM, HIDDEN_DIM, OUTPUT_DIM, DEPTH)

    packed = jax.block_until_ready(pack_params(params))   # one-time packing at "init"

    out = mlp_forward(x, packed)
    out = jax.block_until_ready(out)

    ref = mlp_reference(x, params)
    assert out.shape == (B, OUTPUT_DIM), out.shape
    assert jnp.allclose(out, ref, atol=1e-5, rtol=1e-5), float(jnp.max(jnp.abs(out - ref)))

    print("KERNEL_OK")
</pallas_src>

<mosaic_0001>
module attributes {stable_mosaic.version = 11 : i64} {
  func.func @mlp_kernel(%arg0: i32, %arg1: memref<256x4xf32, #tpu.memory_space<vmem>>, %arg2: memref<4x64xf32, #tpu.memory_space<vmem>>, %arg3: memref<4x64xf32, #tpu.memory_space<vmem>>, %arg4: memref<3x64x64xf32, #tpu.memory_space<vmem>>, %arg5: memref<64x2xf32, #tpu.memory_space<vmem>>, %arg6: memref<1x2xf32, #tpu.memory_space<vmem>>, %arg7: memref<256x2xf32, #tpu.memory_space<vmem>>) attributes {dimension_semantics = [#tpu.dimension_semantics<parallel>], iteration_bounds = array<i64: 1>, scalar_prefetch = 0 : i64, scratch_operands = 0 : i64, tpu.core_type = #tpu.core_type<tc>, window_params = [{transform_indices = @transform_0, window_bounds = array<i64: 256, 4>}, {pipeline_mode = #tpu.pipeline_mode<synchronous>, transform_indices = @transform_1, window_bounds = array<i64: 4, 64>}, {pipeline_mode = #tpu.pipeline_mode<synchronous>, transform_indices = @transform_2, window_bounds = array<i64: 4, 64>}, {pipeline_mode = #tpu.pipeline_mode<synchronous>, transform_indices = @transform_3, window_bounds = array<i64: 3, 64, 64>}, {pipeline_mode = #tpu.pipeline_mode<synchronous>, transform_indices = @transform_4, window_bounds = array<i64: 64, 2>}, {pipeline_mode = #tpu.pipeline_mode<synchronous>, transform_indices = @transform_5, window_bounds = array<i64: 1, 2>}, {transform_indices = @transform_6, window_bounds = array<i64: 256, 2>}]} {
    %c0 = arith.constant 0 : index
    %c0_0 = arith.constant 0 : index
    %0 = vector.load %arg1[%c0, %c0_0] : memref<256x4xf32, #tpu.memory_space<vmem>>, vector<256x4xf32>
    %c0_1 = arith.constant 0 : index
    %c0_2 = arith.constant 0 : index
    %1 = vector.load %arg2[%c0_1, %c0_2] : memref<4x64xf32, #tpu.memory_space<vmem>>, vector<4x64xf32>
    %cst = arith.constant dense<0.000000e+00> : vector<256x64xf32>
    %2 = tpu.matmul %0, %1, %cst {dimension_numbers = #tpu.dot_dimension_numbers<[1], [0], [0], [1], [0, 0, 1, 1], [], []>} : vector<256x4xf32>, vector<4x64xf32>, vector<256x64xf32> -> vector<256x64xf32>
    %c0_3 = arith.constant 0 : index
    %c0_4 = arith.constant 0 : index
    %3 = vector.load %arg3[%c0_3, %c0_4] : memref<4x64xf32, #tpu.memory_space<vmem>>, vector<1x64xf32>
    %4 = vector.broadcast %3 : vector<1x64xf32> to vector<256x64xf32>
    %5 = arith.addf %2, %4 : vector<256x64xf32>
    %6 = math.tanh %5 : vector<256x64xf32>
    %c0_5 = arith.constant 0 : index
    %c0_6 = arith.constant 0 : index
    %c0_7 = arith.constant 0 : index
    %7 = vector.load %arg4[%c0_5, %c0_6, %c0_7] : memref<3x64x64xf32, #tpu.memory_space<vmem>>, vector<1x64x64xf32>
    %8 = vector.shape_cast %7 : vector<1x64x64xf32> to vector<64x64xf32>
    %cst_8 = arith.constant dense<0.000000e+00> : vector<256x64xf32>
    %9 = tpu.matmul %6, %8, %cst_8 {dimension_numbers = #tpu.dot_dimension_numbers<[1], [0], [0], [1], [0, 0, 1, 1], [], []>} : vector<256x64xf32>, vector<64x64xf32>, vector<256x64xf32> -> vector<256x64xf32>
    %c1 = arith.constant 1 : index
    %c0_9 = arith.constant 0 : index
    %10 = vector.load %arg3[%c1, %c0_9] : memref<4x64xf32, #tpu.memory_space<vmem>>, vector<1x64xf32>
    %11 = vector.broadcast %10 : vector<1x64xf32> to vector<256x64xf32>
    %12 = arith.addf %9, %11 : vector<256x64xf32>
    %13 = math.tanh %12 : vector<256x64xf32>
    %c1_10 = arith.constant 1 : index
    %c0_11 = arith.constant 0 : index
    %c0_12 = arith.constant 0 : index
    %14 = vector.load %arg4[%c1_10, %c0_11, %c0_12] : memref<3x64x64xf32, #tpu.memory_space<vmem>>, vector<1x64x64xf32>
    %15 = vector.shape_cast %14 : vector<1x64x64xf32> to vector<64x64xf32>
    %cst_13 = arith.constant dense<0.000000e+00> : vector<256x64xf32>
    %16 = tpu.matmul %13, %15, %cst_13 {dimension_numbers = #tpu.dot_dimension_numbers<[1], [0], [0], [1], [0, 0, 1, 1], [], []>} : vector<256x64xf32>, vector<64x64xf32>, vector<256x64xf32> -> vector<256x64xf32>
    %c2 = arith.constant 2 : index
    %c0_14 = arith.constant 0 : index
    %17 = vector.load %arg3[%c2, %c0_14] : memref<4x64xf32, #tpu.memory_space<vmem>>, vector<1x64xf32>
    %18 = vector.broadcast %17 : vector<1x64xf32> to vector<256x64xf32>
    %19 = arith.addf %16, %18 : vector<256x64xf32>
    %20 = math.tanh %19 : vector<256x64xf32>
    %c2_15 = arith.constant 2 : index
    %c0_16 = arith.constant 0 : index
    %c0_17 = arith.constant 0 : index
    %21 = vector.load %arg4[%c2_15, %c0_16, %c0_17] : memref<3x64x64xf32, #tpu.memory_space<vmem>>, vector<1x64x64xf32>
    %22 = vector.shape_cast %21 : vector<1x64x64xf32> to vector<64x64xf32>
    %cst_18 = arith.constant dense<0.000000e+00> : vector<256x64xf32>
    %23 = tpu.matmul %20, %22, %cst_18 {dimension_numbers = #tpu.dot_dimension_numbers<[1], [0], [0], [1], [0, 0, 1, 1], [], []>} : vector<256x64xf32>, vector<64x64xf32>, vector<256x64xf32> -> vector<256x64xf32>
    %c3 = arith.constant 3 : index
    %c0_19 = arith.constant 0 : index
    %24 = vector.load %arg3[%c3, %c0_19] : memref<4x64xf32, #tpu.memory_space<vmem>>, vector<1x64xf32>
    %25 = vector.broadcast %24 : vector<1x64xf32> to vector<256x64xf32>
    %26 = arith.addf %23, %25 : vector<256x64xf32>
    %27 = math.tanh %26 : vector<256x64xf32>
    %c0_20 = arith.constant 0 : index
    %c0_21 = arith.constant 0 : index
    %28 = vector.load %arg5[%c0_20, %c0_21] : memref<64x2xf32, #tpu.memory_space<vmem>>, vector<64x2xf32>
    %cst_22 = arith.constant dense<0.000000e+00> : vector<256x2xf32>
    %29 = tpu.matmul %27, %28, %cst_22 {dimension_numbers = #tpu.dot_dimension_numbers<[1], [0], [0], [1], [0, 0, 1, 1], [], []>} : vector<256x64xf32>, vector<64x2xf32>, vector<256x2xf32> -> vector<256x2xf32>
    %c0_23 = arith.constant 0 : index
    %c0_24 = arith.constant 0 : index
    %30 = vector.load %arg6[%c0_23, %c0_24] : memref<1x2xf32, #tpu.memory_space<vmem>>, vector<1x2xf32>
    %31 = vector.broadcast %30 : vector<1x2xf32> to vector<256x2xf32>
    %32 = arith.addf %29, %31 : vector<256x2xf32>
    %c0_25 = arith.constant 0 : index
    %c0_26 = arith.constant 0 : index
    %33 = vector.load %arg7[%c0_25, %c0_26] : memref<256x2xf32, #tpu.memory_space<vmem>>, vector<256x2xf32>
    tpu.vector_store %arg7[%c0_25, %c0_26], %32 {strides = array<i32>} : memref<256x2xf32, #tpu.memory_space<vmem>>, vector<256x2xf32>,
    return
  }
  func.func @transform_0(%arg0: i32) -> (i32, i32) {
    %c0_i32 = arith.constant 0 : i32
    %c0_i32_0 = arith.constant 0 : i32
    return %arg0, %c0_i32 : i32, i32
  }
  func.func @transform_1(%arg0: i32) -> (i32, i32) {
    %c0_i32 = arith.constant 0 : i32
    %c0_i32_0 = arith.constant 0 : i32
    %c0_i32_1 = arith.constant 0 : i32
    return %c0_i32, %c0_i32_0 : i32, i32
  }
  func.func @transform_2(%arg0: i32) -> (i32, i32) {
    %c0_i32 = arith.constant 0 : i32
    %c0_i32_0 = arith.constant 0 : i32
    %c0_i32_1 = arith.constant 0 : i32
    return %c0_i32, %c0_i32_0 : i32, i32
  }
  func.func @transform_3(%arg0: i32) -> (i32, i32, i32) {
    %c0_i32 = arith.constant 0 : i32
    %c0_i32_0 = arith.constant 0 : i32
    %c0_i32_1 = arith.constant 0 : i32
    %c0_i32_2 = arith.constant 0 : i32
    return %c0_i32, %c0_i32_0, %c0_i32_1 : i32, i32, i32
  }
  func.func @transform_4(%arg0: i32) -> (i32, i32) {
    %c0_i32 = arith.constant 0 : i32
    %c0_i32_0 = arith.constant 0 : i32
    %c0_i32_1 = arith.constant 0 : i32
    return %c0_i32, %c0_i32_0 : i32, i32
  }
  func.func @transform_5(%arg0: i32) -> (i32, i32) {
    %c0_i32 = arith.constant 0 : i32
    %c0_i32_0 = arith.constant 0 : i32
    %c0_i32_1 = arith.constant 0 : i32
    return %c0_i32, %c0_i32_0 : i32, i32
  }
  func.func @transform_6(%arg0: i32) -> (i32, i32) {
    %c0_i32 = arith.constant 0 : i32
    %c0_i32_0 = arith.constant 0 : i32
    return %arg0, %c0_i32 : i32, i32
  }
}

</mosaic_0001>

<bundles_post_ra>
// kernel: tpu_custom_call.1
= control target key start
LH: loop header
LB: loop body
LE: loop exit
PB: predicated region body
PF: predicated region fallthrough
CT: control target
= control target key end

     0   :  { %vm155_vm0 = vcmask 1043456   ;;  %vm58_vm1 = vcmask 31744   ;;  %vm314_vm2 = vcmask 523264   ;;  %vm1281_vm3 = vcmask 15360   ;;  %s2470_s1 = inlined_call_operand.vmem [shape: f32[4,64], index: 1, kind: input, shape index: {}]   ;;  %s2471_s0 = inlined_call_operand.vmem [shape: f32[256,4], index: 0, kind: input, shape index: {}]   ;;  %s2472_s2 = inlined_call_operand.vmem [shape: f32[4,64], index: 2, kind: input, shape index: {}]   ;;  %s2473_s3 = inlined_call_operand.vmem [shape: f32[3,64,64], index: 3, kind: input, shape index: {}]   ;;  %s2474_s4 = inlined_call_operand.vmem [shape: f32[64,2], index: 4, kind: input, shape index: {}]   ;;  %s2475_s5 = inlined_call_operand.vmem [shape: f32[1,2], index: 5, kind: input, shape index: {}]   ;;  %s2476_s6 = inlined_call_operand.vmem [shape: f32[256,2], index: 6, kind: output, shape index: {}]  }
   0x1   :  { %v55_v0 = vld [vmem:[%s2470_s1] sm:$0xf]  ;;  %v24_v2 = vld [vmem:[%s2471_s0 + $0x8] sm:$0xff]  ;;  %v25_v3 = vld [vmem:[%s2471_s0 + $0x10] sm:$0xff] }
   0x2   :  { %v23_v1 = vld [vmem:[%s2471_s0] sm:$0xff]  ;;  %1318 = vmatpush.msk.msra.mxu0 %vm155_vm0, %v55_v0  ;;  %1495 = vmatpush.msk.msra.mxu1 %vm155_vm0, %v55_v0  ;;  %v26_v4 = vld [vmem:[%s2471_s0 + $0x18] sm:$0xff]  ;;  %v32_v5 = vld [vmem:[%s2471_s0 + $0x48] sm:$0xff] }
   0x3   :  { %1319 = vmatmul.msk.f32.vlgmr.msra.gmra.mxu0 %vm58_vm1, %v23_v1  ;;  %1496 = vmatpush.msk.msra.mxu2 %vm155_vm0, %v55_v0  ;;  %v311_v6 = vld [vmem:[%s2473_s3 + $0x38] sm:$0xff]  ;;  %v27_v7 = vld [vmem:[%s2471_s0 + $0x20] sm:$0xff]  ;;  %v33_v8 = vld [vmem:[%s2471_s0 + $0x50] sm:$0xff] }
   0x4   :  { %1497 = vmatpush.msk.msra.mxu3 %vm155_vm0, %v55_v0  ;;  %1328 = vmatmul.msk.f32.vlgmr.msra.gmra.mxu1 %vm58_vm1, %v32_v5  ;;  %v310_v9 = vld [vmem:[%s2473_s3 + $0x30] sm:$0xff]  ;;  %v309_v10 = vld [vmem:[%s2473_s3 + $0x28] sm:$0xff]  ;;  %v308_v11 = vld [vmem:[%s2473_s3 + $0x20] sm:$0xff] }
   0x5   :  { %419 = vmatpush.msrb.mxu1 %v311_v6  ;;  %v28_v12 = vld [vmem:[%s2471_s0 + $0x28] sm:$0xff]  ;;  %v307_v13 = vld [vmem:[%s2473_s3 + $0x18] sm:$0xff]  ;;  %v306_v15 = vld [vmem:[%s2473_s3 + $0x10] sm:$0xff] }
   0x6   :  { %v34_v14 = vld [vmem:[%s2471_s0 + $0x58] sm:$0xff]  ;;  %v305_v16 = vld [vmem:[%s2473_s3 + $0x8] sm:$0xff]  ;;  %v29_v17 = vld [vmem:[%s2471_s0 + $0x30] sm:$0xff] }
   0x7   :  { %420 = vmatpush.msrb.mxu1 %v310_v9  ;;  %v35_v18 = vld [vmem:[%s2471_s0 + $0x60] sm:$0xff]  ;;  %v30_v19 = vld [vmem:[%s2471_s0 + $0x38] sm:$0xff]  ;;  %v36_v20 = vld [vmem:[%s2471_s0 + $0x68] sm:$0xff] }
   0x8   :  { %v31_v21 = vld [vmem:[%s2471_s0 + $0x40] sm:$0xff]  ;;  %v37_v22 = vld [vmem:[%s2471_s0 + $0x70] sm:$0xff]  ;;  %v38_v23 = vld [vmem:[%s2471_s0 + $0x78] sm:$0xff] }
   0x9   :  { %421 = vmatpush.msrb.mxu1 %v309_v10  ;;  %v39_v24 = vld [vmem:[%s2471_s0 + $0x80] sm:$0xff]  ;;  %v40_v25 = vld [vmem:[%s2471_s0 + $0x88] sm:$0xff]  ;;  %v41_v27 = vld [vmem:[%s2471_s0 + $0x90] sm:$0xff] }
   0xa   :  { %v304_v26 = vld [vmem:[%s2473_s3] sm:$0xff]  ;;  %1337 = vmatmul.msk.f32.vlgmr.msra.gmra.mxu2 %vm58_vm1, %v41_v27  ;;  %v42_v28 = vld [vmem:[%s2471_s0 + $0x98] sm:$0xff]  ;;  %v44_v33 = vld [vmem:[%s2471_s0 + $0xa8] sm:$0xff] }
   0xb   :  { %1320 = vmatmul.msk.f32.gmra.mxu0 %vm58_vm1, %v24_v2  ;;  %422 = vmatpush.msrb.mxu1 %v308_v11  ;;  %v43_v29 = vld [vmem:[%s2471_s0 + $0xa0] sm:$0xff]  ;;  %v45_v37 = vld [vmem:[%s2471_s0 + $0xb0] sm:$0xff]  ;;  %v46_v41 = vld [vmem:[%s2471_s0 + $0xb8] sm:$0xff] }
   0xc   :  { %1329 = vmatmul.msk.f32.gmra.mxu1 %vm58_vm1, %v33_v8  ;;  %v1916_v30 = vld [vmem:[%s2472_s2] ss:$0 sm:$0xff]  ;;  %v48_v49 = vld [vmem:[%s2471_s0 + $0xc8] sm:$0xff]  ;;  %v49_v53 = vld [vmem:[%s2471_s0 + $0xd0] sm:$0xff] }
   0xd   :  { %423 = vmatpush.msrb.mxu1 %v307_v13  ;;  %v47_v45 = vld [vmem:[%s2471_s0 + $0xc0] sm:$0xff]  ;;  %v1390_v54 = vld [vmem:[%s2473_s3 + $0x78] sm:$0xff]  ;;  %1345 = vmatmul.msk.f32.vlgmr.msra.gmra.mxu3 %vm58_vm1, %v49_v53  ;;  %v1389_v60 = vld [vmem:[%s2473_s3 + $0x70] sm:$0xff] }
   0xe   :  { %671 = vmatpush.msrb.mxu2 %v1390_v54  ;;  %v50_v59 = vld [vmem:[%s2471_s0 + $0xd8] sm:$0xff]  ;;  %v51_v1 = vld [vmem:[%s2471_s0 + $0xe0] sm:$0xff]  ;;  %v1388_v2 = vld [vmem:[%s2473_s3 + $0x68] sm:$0xff] }
   0xf   :  { %424 = vmatpush.msrb.mxu1 %v306_v15  ;;  %v1387_v8 = vld [vmem:[%s2473_s3 + $0x60] sm:$0xff]  ;;  %v53_v11 = vld [vmem:[%s2471_s0 + $0xf0] sm:$0xff] }
  0x10   :  { %672 = vmatpush.msrb.mxu2 %v1389_v60 }
  0x11   :  { %425 = vmatpush.msrb.mxu1 %v305_v16  ;;  %v54_v16 = vld [vmem:[%s2471_s0 + $0xf8] sm:$0xff] }
  0x12   :  { %1338 = vmatmul.msk.f32.gmra.mxu2 %vm58_vm1, %v42_v28  ;;  %v1383_v28 = vld [vmem:[%s2473_s3 + $0x40] sm:$0xff] }
  0x13   :  { %1321 = vmatmul.msk.f32.gmra.mxu0 %vm58_vm1, %v25_v3  ;;  %426 = vmatpush.msrb.mxu1 %v304_v26 }
  0x14   :  { %1330 = vmatmul.msk.f32.gmra.mxu1 %vm58_vm1, %v34_v14  ;;  %673 = vmatpush.msrb.mxu2 %v1388_v2 }
  0x15   :  { %1346 = vmatmul.msk.f32.gmra.mxu3 %vm58_vm1, %v50_v59 }
  0x16   :  { %674 = vmatpush.msrb.mxu2 %v1387_v8 }
  0x1a   :  { %1339 = vmatmul.msk.f32.gmra.mxu2 %vm58_vm1, %v43_v29 }
  0x1b   :  { %1322 = vmatmul.msk.f32.gmra.mxu0 %vm58_vm1, %v26_v4 }
  0x1c   :  { %1331 = vmatmul.msk.f32.gmra.mxu1 %vm58_vm1, %v35_v18 }
  0x1d   :  { %1347 = vmatmul.msk.f32.gmra.mxu3 %vm58_vm1, %v51_v1 }
  0x22   :  { %1340 = vmatmul.msk.f32.gmra.mxu2 %vm58_vm1, %v44_v33 }
  0x23   :  { %1323 = vmatmul.msk.f32.gmra.mxu0 %vm58_vm1, %v27_v7  ;;  %v52_v7 = vld [vmem:[%s2471_s0 + $0xe8] sm:$0xff] }
  0x24   :  { %1332 = vmatmul.msk.f32.gmra.mxu1 %vm58_vm1, %v36_v20 }
  0x25   :  { %1348 = vmatmul.msk.f32.gmra.mxu3 %vm58_vm1, %v52_v7 }
  0x2a   :  { %1341 = vmatmul.msk.f32.gmra.mxu2 %vm58_vm1, %v45_v37 }
  0x2b   :  { %1324 = vmatmul.msk.f32.gmra.mxu0 %vm58_vm1, %v28_v12  ;;  %v1386_v12 = vld [vmem:[%s2473_s3 + $0x58] sm:$0xff] }
  0x2c   :  { %1333 = vmatmul.msk.f32.gmra.mxu1 %vm58_vm1, %v37_v22  ;;  %675 = vmatpush.msrb.mxu2 %v1386_v12 }
  0x2d   :  { %1349 = vmatmul.msk.f32.gmra.mxu3 %vm58_vm1, %v53_v11 }
  0x32   :  { %1342 = vmatmul.msk.f32.gmra.mxu2 %vm58_vm1, %v46_v41 }
  0x33   :  { %1325 = vmatmul.msk.f32.gmra.mxu0 %vm58_vm1, %v29_v17  ;;  %v1385_v17 = vld [vmem:[%s2473_s3 + $0x50] sm:$0xff] }
  0x34   :  { %1334 = vmatmul.msk.f32.gmra.mxu1 %vm58_vm1, %v38_v23  ;;  %676 = vmatpush.msrb.mxu2 %v1385_v17 }
  0x35   :  { %1350 = vmatmul.msk.f32.gmra.mxu3 %vm58_vm1, %v54_v16 }
  0x3a   :  { %1343 = vmatmul.msk.f32.gmra.mxu2 %vm58_vm1, %v47_v45 }
  0x3b   :  { %1326 = vmatmul.msk.f32.gmra.mxu0 %vm58_vm1, %v30_v19 }
  0x3c   :  { %1335 = vmatmul.msk.f32.gmra.mxu1 %vm58_vm1, %v39_v24 }
  0x42   :  { %1344 = vmatmul.msk.f32.gmra.mxu2 %vm58_vm1, %v48_v49 }
  0x43   :  { %1327 = vmatmul.msk.f32.gmra.mxu0 %vm58_vm1, %v31_v21  ;;  %v1384_v21 = vld [vmem:[%s2473_s3 + $0x48] sm:$0xff] }
  0x44   :  { %1336 = vmatmul.msk.f32.gmra.mxu1 %vm58_vm1, %v40_v25  ;;  %677 = vmatpush.msrb.mxu2 %v1384_v21 }
  0x46   :  { %678 = vmatpush.msrb.mxu2 %v1383_v28 }
  0x80   :  { %v176_v31 = vpop.f32.mrf.mxu0 }
  0x81   :  { %v177_v32 = vadd.f32 %v1916_v30, %v176_v31  ;;  %v203_v55 = vpop.f32.mrf.mxu1 }
  0x82   :  { %v204_v9 = vadd.f32 %v1916_v30, %v203_v55 }
  0x83   :  { %1511 = vtanh.f32 %v177_v32 }
  0x88   :  { %v179_v34 = vpop.f32.mrf.mxu0 }
  0x89   :  { %v1512_v35 = vpop.eup %1511  ;;  %v180_v36 = vadd.f32 %v1916_v30, %v179_v34  ;;  %v206_v61 = vpop.f32.mrf.mxu1 }
  0x8a   :  { %1351 = vmatmul.msk.f32.vlgmr.msrb.gmra.mxu1 %vm314_vm2, %v1512_v35  ;;  %v207_v14 = vadd.f32 %v1916_v30, %v206_v61 }
  0x8b   :  { %1513 = vtanh.f32 %v180_v36 }
  0x8d   :  { %v230_v35 = vpop.f32.mrf.mxu2 }
  0x8e   :  { %v231_v45 = vadd.f32 %v1916_v30, %v230_v35 }
  0x90   :  { %v182_v38 = vpop.f32.mrf.mxu0  ;;  %v254_v21 = vpop.f32.mrf.mxu3 }
  0x91   :  { %v1514_v39 = vpop.eup %1513  ;;  %v183_v40 = vadd.f32 %v1916_v30, %v182_v38  ;;  %v209_v6 = vpop.f32.mrf.mxu1 }
  0x92   :  { %1352 = vmatmul.msk.f32.gmra.mxu1 %vm314_vm2, %v1514_v39  ;;  %v210_v19 = vadd.f32 %v1916_v30, %v209_v6  ;;  %v2022_v39 = vld [vmem:[%s2472_s2 + $0x1] ss:$0 sm:$0xff] }
  0x93   :  { %1515 = vtanh.f32 %v183_v40 }
  0x95   :  { %v233_v40 = vpop.f32.mrf.mxu2 }
  0x98   :  { %v185_v42 = vpop.f32.mrf.mxu0  ;;  %v257_v28 = vpop.f32.mrf.mxu3 }
  0x99   :  { %v1516_v43 = vpop.eup %1515  ;;  %v186_v44 = vadd.f32 %v1916_v30, %v185_v42  ;;  %v212_v13 = vpop.f32.mrf.mxu1 }
  0x9a   :  { %1353 = vmatmul.msk.f32.gmra.mxu1 %vm314_vm2, %v1516_v43  ;;  %v213_v22 = vadd.f32 %v1916_v30, %v212_v13 }
  0x9b   :  { %1517 = vtanh.f32 %v186_v44 }
  0x9d   :  { %v236_v49 = vpop.f32.mrf.mxu2 }
  0xa0   :  { %v188_v46 = vpop.f32.mrf.mxu0 }
  0xa1   :  { %v1518_v47 = vpop.eup %1517  ;;  %v189_v48 = vadd.f32 %v1916_v30, %v188_v46  ;;  %v215_v18 = vpop.f32.mrf.mxu1 }
  0xa2   :  { %1354 = vmatmul.msk.f32.gmra.mxu1 %vm314_vm2, %v1518_v47  ;;  %v216_v25 = vadd.f32 %v1916_v30, %v215_v18 }
  0xa3   :  { %1519 = vtanh.f32 %v189_v48 }
  0xa8   :  { %v191_v50 = vpop.f32.mrf.mxu0 }
  0xa9   :  { %v1520_v51 = vpop.eup %1519  ;;  %v192_v52 = vadd.f32 %v1916_v30, %v191_v50  ;;  %v218_v23 = vpop.f32.mrf.mxu1 }
  0xaa   :  { %1355 = vmatmul.msk.f32.gmra.mxu1 %vm314_vm2, %v1520_v51  ;;  %v219_v29 = vadd.f32 %v1916_v30, %v218_v23  ;;  %v234_v51 = vadd.f32 %v1916_v30, %v233_v40 }
  0xab   :  { %1521 = vtanh.f32 %v192_v52 }
  0xb0   :  { %v194_v56 = vpop.f32.mrf.mxu0 }
  0xb1   :  { %v1522_v57 = vpop.eup %1521  ;;  %v195_v58 = vadd.f32 %v1916_v30, %v194_v56  ;;  %v221_v27 = vpop.f32.mrf.mxu1 }
  0xb2   :  { %1356 = vmatmul.msk.f32.gmra.mxu1 %vm314_vm2, %v1522_v57  ;;  %v222_v33 = vadd.f32 %v1916_v30, %v221_v27  ;;  %v239_v56 = vpop.f32.mrf.mxu2  ;;  %v237_v57 = vadd.f32 %v1916_v30, %v236_v49 }
  0xb3   :  { %1523 = vtanh.f32 %v195_v58 }
  0xb8   :  { %v197_v62 = vpop.f32.mrf.mxu0 }
  0xb9   :  { %v1524_v63 = vpop.eup %1523  ;;  %v198_v0 = vadd.f32 %v1916_v30, %v197_v62  ;;  %v224_v32 = vpop.f32.mrf.mxu1 }
  0xba   :  { %1357 = vmatmul.msk.f32.gmra.mxu1 %vm314_vm2, %v1524_v63  ;;  %v225_v37 = vadd.f32 %v1916_v30, %v224_v32  ;;  %v242_v62 = vpop.f32.mrf.mxu2  ;;  %v240_v63 = vadd.f32 %v1916_v30, %v239_v56 }
  0xbb   :  { %1525 = vtanh.f32 %v198_v0 }
  0xc0   :  { %v200_v3 = vpop.f32.mrf.mxu0 }
  0xc1   :  { %v1526_v4 = vpop.eup %1525  ;;  %v201_v5 = vadd.f32 %v1916_v30, %v200_v3  ;;  %v227_v36 = vpop.f32.mrf.mxu1 }
  0xc2   :  { %1358 = vmatmul.msk.f32.gmra.mxu1 %vm314_vm2, %v1526_v4  ;;  %v228_v41 = vadd.f32 %v1916_v30, %v227_v36  ;;  %v243_v4 = vadd.f32 %v1916_v30, %v242_v62  ;;  %v1429_v36 = vld [vmem:[%s2473_s3 + $0xb0] sm:$0xff] }
  0xc3   :  { %1527 = vtanh.f32 %v201_v5  ;;  %v245_v5 = vpop.f32.mrf.mxu2 }
  0xc4   :  { %1529 = vtanh.f32 %v204_v9 }
  0xc5   :  { %1531 = vtanh.f32 %v207_v14 }
  0xc6   :  { %1533 = vtanh.f32 %v210_v19 }
  0xc7   :  { %1535 = vtanh.f32 %v213_v22 }
  0xc8   :  { %1537 = vtanh.f32 %v216_v25 }
  0xc9   :  { %v1528_v10 = vpop.eup %1527  ;;  %1539 = vtanh.f32 %v219_v29  ;;  %v1430_v29 = vld [vmem:[%s2473_s3 + $0xb8] sm:$0xff] }
  0xca   :  { %1359 = vmatmul.msk.f32.gmra.mxu1 %vm314_vm2, %v1528_v10  ;;  %v1530_v15 = vpop.eup %1529  ;;  %1541 = vtanh.f32 %v222_v33  ;;  %v246_v10 = vadd.f32 %v1916_v30, %v245_v5  ;;  %923 = vmatpush.msrb.mxu3 %v1430_v29 }
  0xcb   :  { %v1532_v20 = vpop.eup %1531  ;;  %1543 = vtanh.f32 %v225_v37  ;;  %v260_v37 = vpop.f32.mrf.mxu3 }
  0xcc   :  { %v1534_v24 = vpop.eup %1533  ;;  %924 = vmatpush.msrb.mxu3 %v1429_v36 }
  0xcd   :  { %v1536_v26 = vpop.eup %1535 }
  0xce   :  { %v1538_v31 = vpop.eup %1537 }
  0xcf   :  { %v1540_v34 = vpop.eup %1539 }
  0xd0   :  { %v1542_v38 = vpop.eup %1541 }
  0xd1   :  { %v1544_v44 = vpop.eup %1543 }
  0xd2   :  { %1360 = vmatmul.msk.f32.gmra.mxu1 %vm314_vm2, %v1530_v15  ;;  %v248_v15 = vpop.f32.mrf.mxu2 }
  0xd3   :  { %v249_v16 = vadd.f32 %v1916_v30, %v248_v15 }
  0xda   :  { %1361 = vmatmul.msk.f32.gmra.mxu1 %vm314_vm2, %v1532_v20  ;;  %v251_v22 = vpop.f32.mrf.mxu2 }
  0xdb   :  { %v252_v23 = vadd.f32 %v1916_v30, %v251_v22 }
  0xe2   :  { %1362 = vmatmul.msk.f32.gmra.mxu1 %vm314_vm2, %v1534_v24 }
  0xea   :  { %1363 = vmatmul.msk.f32.gmra.mxu1 %vm314_vm2, %v1536_v26 }
  0xf2   :  { %1364 = vmatmul.msk.f32.gmra.mxu1 %vm314_vm2, %v1538_v31  ;;  %v255_v31 = vadd.f32 %v1916_v30, %v254_v21 }
  0xfa   :  { %1365 = vmatmul.msk.f32.gmra.mxu1 %vm314_vm2, %v1540_v34 }
 0x102   :  { %1366 = vmatmul.msk.f32.gmra.mxu1 %vm314_vm2, %v1542_v38  ;;  %v258_v38 = vadd.f32 %v1916_v30, %v257_v28 }
 0x107   :  { %v428_v42 = vpop.f32.mrf.mxu1 }
 0x108   :  { %v429_v43 = vadd.f32 %v2022_v39, %v428_v42 }
 0x10a   :  { %1545 = vtanh.f32 %v429_v43  ;;  %1367 = vmatmul.msk.f32.gmra.mxu1 %vm314_vm2, %v1544_v44  ;;  %v1428_v44 = vld [vmem:[%s2473_s3 + $0xa8] sm:$0xff] }
 0x10b   :  { %1547 = vtanh.f32 %v228_v41  ;;  %925 = vmatpush.msrb.mxu3 %v1428_v44 }
 0x10c   :  { %1549 = vtanh.f32 %v231_v45  ;;  %v261_v45 = vadd.f32 %v1916_v30, %v260_v37 }
 0x10f   :  { %v431_v46 = vpop.f32.mrf.mxu1 }
 0x110   :  { %v1546_v47 = vpop.eup %1545  ;;  %v432_v48 = vadd.f32 %v2022_v39, %v431_v46  ;;  %v263_v46 = vpop.f32.mrf.mxu3 }
 0x111   :  { %v1548_v50 = vpop.eup %1547  ;;  %1391 = vmatmul.msk.f32.vlgmr.msrb.gmra.mxu2 %vm314_vm2, %v1546_v47 }
 0x112   :  { %1551 = vtanh.f32 %v432_v48  ;;  %1368 = vmatmul.msk.f32.gmra.mxu1 %vm314_vm2, %v1548_v50  ;;  %v1550_v52 = vpop.eup %1549 }
 0x113   :  { %1553 = vtanh.f32 %v234_v51  ;;  %v1427_v51 = vld [vmem:[%s2473_s3 + $0xa0] sm:$0xff] }
 0x114   :  { %926 = vmatpush.msrb.mxu3 %v1427_v51 }
 0x117   :  { %v434_v53 = vpop.f32.mrf.mxu1 }
 0x118   :  { %v1552_v54 = vpop.eup %1551  ;;  %v435_v55 = vadd.f32 %v2022_v39, %v434_v53  ;;  %v264_v53 = vadd.f32 %v1916_v30, %v263_v46 }
 0x119   :  { %1392 = vmatmul.msk.f32.gmra.mxu2 %vm314_vm2, %v1552_v54  ;;  %v1554_v58 = vpop.eup %1553 }
 0x11a   :  { %1555 = vtanh.f32 %v435_v55  ;;  %1369 = vmatmul.msk.f32.gmra.mxu1 %vm314_vm2, %v1550_v52  ;;  %v1426_v52 = vld [vmem:[%s2473_s3 + $0x98] sm:$0xff] }
 0x11b   :  { %1557 = vtanh.f32 %v237_v57  ;;  %927 = vmatpush.msrb.mxu3 %v1426_v52 }
 0x11f   :  { %v437_v59 = vpop.f32.mrf.mxu1 }
 0x120   :  { %v1556_v60 = vpop.eup %1555  ;;  %v438_v61 = vadd.f32 %v2022_v39, %v437_v59  ;;  %v1425_v59 = vld [vmem:[%s2473_s3 + $0x90] sm:$0xff] }
 0x121   :  { %1393 = vmatmul.msk.f32.gmra.mxu2 %vm314_vm2, %v1556_v60  ;;  %v1558_v0 = vpop.eup %1557  ;;  %928 = vmatpush.msrb.mxu3 %v1425_v59 }
 0x122   :  { %1559 = vtanh.f32 %v438_v61  ;;  %1370 = vmatmul.msk.f32.gmra.mxu1 %vm314_vm2, %v1554_v58  ;;  %v266_v58 = vpop.f32.mrf.mxu3 }
 0x123   :  { %1561 = vtanh.f32 %v240_v63  ;;  %v267_v60 = vadd.f32 %v1916_v30, %v266_v58 }
 0x127   :  { %v440_v1 = vpop.f32.mrf.mxu1 }
 0x128   :  { %v1560_v2 = vpop.eup %1559  ;;  %v441_v3 = vadd.f32 %v2022_v39, %v440_v1 }
 0x129   :  { %1394 = vmatmul.msk.f32.gmra.mxu2 %vm314_vm2, %v1560_v2  ;;  %v1562_v6 = vpop.eup %1561  ;;  %v1424_v2 = vld [vmem:[%s2473_s3 + $0x88] sm:$0xff] }
 0x12a   :  { %1563 = vtanh.f32 %v441_v3  ;;  %1371 = vmatmul.msk.f32.gmra.mxu1 %vm314_vm2, %v1558_v0  ;;  %v269_v1 = vpop.f32.mrf.mxu3  ;;  %929 = vmatpush.msrb.mxu3 %v1424_v2 }
 0x12b   :  { %1565 = vtanh.f32 %v243_v4  ;;  %v270_v3 = vadd.f32 %v1916_v30, %v269_v1 }
 0x12f   :  { %v443_v7 = vpop.f32.mrf.mxu1 }
 0x130   :  { %v1564_v8 = vpop.eup %1563  ;;  %v444_v9 = vadd.f32 %v2022_v39, %v443_v7 }
 0x131   :  { %1395 = vmatmul.msk.f32.gmra.mxu2 %vm314_vm2, %v1564_v8  ;;  %v1566_v11 = vpop.eup %1565  ;;  %v1423_v8 = vld [vmem:[%s2473_s3 + $0x80] sm:$0xff] }
 0x132   :  { %1567 = vtanh.f32 %v444_v9  ;;  %1372 = vmatmul.msk.f32.gmra.mxu1 %vm314_vm2, %v1562_v6  ;;  %930 = vmatpush.msrb.mxu3 %v1423_v8 }
 0x133   :  { %1569 = vtanh.f32 %v246_v10 }
 0x137   :  { %v446_v12 = vpop.f32.mrf.mxu1 }
 0x138   :  { %v1568_v13 = vpop.eup %1567  ;;  %v447_v14 = vadd.f32 %v2022_v39, %v446_v12 }
 0x139   :  { %1396 = vmatmul.msk.f32.gmra.mxu2 %vm314_vm2, %v1568_v13  ;;  %v1570_v17 = vpop.eup %1569 }
 0x13a   :  { %1571 = vtanh.f32 %v447_v14  ;;  %1373 = vmatmul.msk.f32.gmra.mxu1 %vm314_vm2, %v1566_v11 }
 0x13b   :  { %1573 = vtanh.f32 %v249_v16 }
 0x13f   :  { %v449_v18 = vpop.f32.mrf.mxu1 }
 0x140   :  { %v1572_v19 = vpop.eup %1571  ;;  %v450_v20 = vadd.f32 %v2022_v39, %v449_v18  ;;  %v2117_v18 = vld [vmem:[%s2472_s2 + $0x2] ss:$0 sm:$0xff] }
 0x141   :  { %1397 = vmatmul.msk.f32.gmra.mxu2 %vm314_vm2, %v1572_v19  ;;  %v1574_v24 = vpop.eup %1573 }
 0x142   :  { %1575 = vtanh.f32 %v450_v20  ;;  %1374 = vmatmul.msk.f32.gmra.mxu1 %vm314_vm2, %v1570_v17 }
 0x143   :  { %1577 = vtanh.f32 %v252_v23 }
 0x147   :  { %v452_v25 = vpop.f32.mrf.mxu1 }
 0x148   :  { %v1576_v26 = vpop.eup %1575  ;;  %v453_v27 = vadd.f32 %v2022_v39, %v452_v25 }
 0x149   :  { %1398 = vmatmul.msk.f32.gmra.mxu2 %vm314_vm2, %v1576_v26  ;;  %v1578_v32 = vpop.eup %1577 }
 0x14a   :  { %1579 = vtanh.f32 %v453_v27  ;;  %1375 = vmatmul.msk.f32.gmra.mxu1 %vm314_vm2, %v1574_v24 }
 0x14b   :  { %1581 = vtanh.f32 %v255_v31 }
 0x14f   :  { %v455_v33 = vpop.f32.mrf.mxu1 }
 0x150   :  { %v1580_v34 = vpop.eup %1579  ;;  %v456_v35 = vadd.f32 %v2022_v39, %v455_v33 }
 0x151   :  { %1399 = vmatmul.msk.f32.gmra.mxu2 %vm314_vm2, %v1580_v34  ;;  %v1582_v40 = vpop.eup %1581 }
 0x152   :  { %1583 = vtanh.f32 %v456_v35  ;;  %1376 = vmatmul.msk.f32.gmra.mxu1 %vm314_vm2, %v1578_v32 }
 0x153   :  { %1585 = vtanh.f32 %v258_v38 }
 0x157   :  { %v458_v41 = vpop.f32.mrf.mxu1 }
 0x158   :  { %v1584_v42 = vpop.eup %1583  ;;  %v459_v43 = vadd.f32 %v2022_v39, %v458_v41 }
 0x159   :  { %1400 = vmatmul.msk.f32.gmra.mxu2 %vm314_vm2, %v1584_v42  ;;  %v1586_v47 = vpop.eup %1585 }
 0x15a   :  { %1587 = vtanh.f32 %v459_v43  ;;  %1377 = vmatmul.msk.f32.gmra.mxu1 %vm314_vm2, %v1582_v40 }
 0x15b   :  { %1589 = vtanh.f32 %v261_v45 }
 0x15f   :  { %v461_v48 = vpop.f32.mrf.mxu1 }
 0x160   :  { %v1588_v49 = vpop.eup %1587  ;;  %v462_v50 = vadd.f32 %v2022_v39, %v461_v48 }
 0x161   :  { %1401 = vmatmul.msk.f32.gmra.mxu2 %vm314_vm2, %v1588_v49  ;;  %v1590_v54 = vpop.eup %1589 }
 0x162   :  { %1591 = vtanh.f32 %v462_v50  ;;  %1378 = vmatmul.msk.f32.gmra.mxu1 %vm314_vm2, %v1586_v47 }
 0x163   :  { %1593 = vtanh.f32 %v264_v53 }
 0x167   :  { %v464_v55 = vpop.f32.mrf.mxu1 }
 0x168   :  { %v1592_v56 = vpop.eup %1591  ;;  %v465_v57 = vadd.f32 %v2022_v39, %v464_v55 }
 0x169   :  { %1402 = vmatmul.msk.f32.gmra.mxu2 %vm314_vm2, %v1592_v56  ;;  %v1594_v61 = vpop.eup %1593 }
 0x16a   :  { %1595 = vtanh.f32 %v465_v57  ;;  %1379 = vmatmul.msk.f32.gmra.mxu1 %vm314_vm2, %v1590_v54 }
 0x16b   :  { %1597 = vtanh.f32 %v267_v60 }
 0x16f   :  { %v467_v62 = vpop.f32.mrf.mxu1 }
 0x170   :  { %v1596_v63 = vpop.eup %1595  ;;  %v468_v0 = vadd.f32 %v2022_v39, %v467_v62 }
 0x171   :  { %1403 = vmatmul.msk.f32.gmra.mxu2 %vm314_vm2, %v1596_v63  ;;  %v1598_v4 = vpop.eup %1597 }
 0x172   :  { %1599 = vtanh.f32 %v468_v0  ;;  %1380 = vmatmul.msk.f32.gmra.mxu1 %vm314_vm2, %v1594_v61 }
 0x173   :  { %1601 = vtanh.f32 %v270_v3 }
 0x177   :  { %v470_v5 = vpop.f32.mrf.mxu1 }
 0x178   :  { %v1600_v6 = vpop.eup %1599  ;;  %v471_v7 = vadd.f32 %v2022_v39, %v470_v5 }
 0x179   :  { %1404 = vmatmul.msk.f32.gmra.mxu2 %vm314_vm2, %v1600_v6  ;;  %v1602_v9 = vpop.eup %1601 }
 0x17a   :  { %1603 = vtanh.f32 %v471_v7  ;;  %1381 = vmatmul.msk.f32.gmra.mxu1 %vm314_vm2, %v1598_v4  ;;  %v1067_v4 = vld [vmem:[%s2474_s4 + $0x38] sm:$0xff] }
 0x17b   :  { %1176 = vmatpush.msrb.mxu0 %v1067_v4  ;;  %1498 = vmatpush.msra.mxu3 %v1067_v4 }
 0x17f   :  { %v473_v10 = vpop.f32.mrf.mxu1 }
 0x180   :  { %v1604_v11 = vpop.eup %1603  ;;  %v474_v30 = vadd.f32 %v2022_v39, %v473_v10 }
 0x181   :  { %1405 = vmatmul.msk.f32.gmra.mxu2 %vm314_vm2, %v1604_v11  ;;  %v1066_v11 = vld [vmem:[%s2474_s4 + $0x30] sm:$0xff] }
 0x182   :  { %1605 = vtanh.f32 %v474_v30  ;;  %1382 = vmatmul.msk.f32.gmra.mxu1 %vm314_vm2, %v1602_v9  ;;  %1177 = vmatpush.msrb.mxu0 %v1066_v11 }
 0x183   :  { %1499 = vmatpush.msra.mxu3 %v1066_v11 }
 0x187   :  { %v476_v12 = vpop.f32.mrf.mxu1 }
 0x188   :  { %v1606_v13 = vpop.eup %1605  ;;  %v477_v14 = vadd.f32 %v2022_v39, %v476_v12 }
 0x189   :  { %1406 = vmatmul.msk.f32.gmra.mxu2 %vm314_vm2, %v1606_v13 }
 0x18a   :  { %1607 = vtanh.f32 %v477_v14 }
 0x18f   :  { %v479_v15 = vpop.f32.mrf.mxu1 }
 0x190   :  { %v1608_v16 = vpop.eup %1607  ;;  %v480_v17 = vadd.f32 %v2022_v39, %v479_v15 }
 0x191   :  { %1407 = vmatmul.msk.f32.gmra.mxu2 %vm314_vm2, %v1608_v16 }
 0x192   :  { %1609 = vtanh.f32 %v480_v17  ;;  %v1065_v17 = vld [vmem:[%s2474_s4 + $0x28] sm:$0xff] }
 0x193   :  { %1178 = vmatpush.msrb.mxu0 %v1065_v17  ;;  %1500 = vmatpush.msra.mxu3 %v1065_v17 }
 0x194   :  { %v680_v19 = vpop.f32.mrf.mxu2 }
 0x195   :  { %v681_v20 = vadd.f32 %v2117_v18, %v680_v19 }
 0x197   :  { %1611 = vtanh.f32 %v681_v20  ;;  %v482_v21 = vpop.f32.mrf.mxu1 }
 0x198   :  { %v1610_v22 = vpop.eup %1609  ;;  %v483_v23 = vadd.f32 %v2022_v39, %v482_v21 }
 0x199   :  { %1408 = vmatmul.msk.f32.gmra.mxu2 %vm314_vm2, %v1610_v22 }
 0x19a   :  { %1613 = vtanh.f32 %v483_v23 }
 0x19c   :  { %v683_v24 = vpop.f32.mrf.mxu2 }
 0x19d   :  { %v1612_v25 = vpop.eup %1611  ;;  %v684_v26 = vadd.f32 %v2117_v18, %v683_v24 }
 0x19e   :  { %1431 = vmatmul.msk.f32.vlgmr.msrb.gmra.mxu3 %vm314_vm2, %v1612_v25 }
 0x19f   :  { %1615 = vtanh.f32 %v684_v26  ;;  %v485_v27 = vpop.f32.mrf.mxu1 }
 0x1a0   :  { %v1614_v28 = vpop.eup %1613  ;;  %v486_v29 = vadd.f32 %v2022_v39, %v485_v27 }
 0x1a1   :  { %1409 = vmatmul.msk.f32.gmra.mxu2 %vm314_vm2, %v1614_v28 }
 0x1a2   :  { %1617 = vtanh.f32 %v486_v29  ;;  %v1064_v29 = vld [vmem:[%s2474_s4 + $0x20] sm:$0xff] }
 0x1a3   :  { %1179 = vmatpush.msrb.mxu0 %v1064_v29  ;;  %1501 = vmatpush.msra.mxu3 %v1064_v29 }
 0x1a4   :  { %v686_v31 = vpop.f32.mrf.mxu2 }
 0x1a5   :  { %v1616_v32 = vpop.eup %1615  ;;  %v687_v33 = vadd.f32 %v2117_v18, %v686_v31 }
 0x1a6   :  { %1432 = vmatmul.msk.f32.gmra.mxu3 %vm314_vm2, %v1616_v32 }
 0x1a7   :  { %1619 = vtanh.f32 %v687_v33  ;;  %v488_v34 = vpop.f32.mrf.mxu1 }
 0x1a8   :  { %v1618_v35 = vpop.eup %1617  ;;  %v489_v36 = vadd.f32 %v2022_v39, %v488_v34 }
 0x1a9   :  { %1410 = vmatmul.msk.f32.gmra.mxu2 %vm314_vm2, %v1618_v35 }
 0x1aa   :  { %1621 = vtanh.f32 %v489_v36 }
 0x1ac   :  { %v689_v37 = vpop.f32.mrf.mxu2 }
 0x1ad   :  { %v1620_v38 = vpop.eup %1619  ;;  %v690_v40 = vadd.f32 %v2117_v18, %v689_v37  ;;  %v1063_v37 = vld [vmem:[%s2474_s4 + $0x18] sm:$0xff] }
 0x1ae   :  { %1433 = vmatmul.msk.f32.gmra.mxu3 %vm314_vm2, %v1620_v38  ;;  %1180 = vmatpush.msrb.mxu0 %v1063_v37 }
 0x1af   :  { %1623 = vtanh.f32 %v690_v40  ;;  %v491_v41 = vpop.f32.mrf.mxu1  ;;  %1502 = vmatpush.msra.mxu3 %v1063_v37 }
 0x1b0   :  { %v1622_v42 = vpop.eup %1621  ;;  %v492_v43 = vadd.f32 %v2022_v39, %v491_v41 }
 0x1b1   :  { %1411 = vmatmul.msk.f32.gmra.mxu2 %vm314_vm2, %v1622_v42 }
 0x1b2   :  { %1625 = vtanh.f32 %v492_v43 }
 0x1b4   :  { %v692_v44 = vpop.f32.mrf.mxu2 }
 0x1b5   :  { %v1624_v45 = vpop.eup %1623  ;;  %v693_v46 = vadd.f32 %v2117_v18, %v692_v44 }
 0x1b6   :  { %1434 = vmatmul.msk.f32.gmra.mxu3 %vm314_vm2, %v1624_v45  ;;  %v1062_v45 = vld [vmem:[%s2474_s4 + $0x10] sm:$0xff] }
 0x1b7   :  { %1627 = vtanh.f32 %v693_v46  ;;  %v494_v47 = vpop.f32.mrf.mxu1  ;;  %1181 = vmatpush.msrb.mxu0 %v1062_v45  ;;  %1503 = vmatpush.msra.mxu3 %v1062_v45 }
 0x1b8   :  { %v1626_v48 = vpop.eup %1625  ;;  %v495_v49 = vadd.f32 %v2022_v39, %v494_v47 }
 0x1b9   :  { %1412 = vmatmul.msk.f32.gmra.mxu2 %vm314_vm2, %v1626_v48 }
 0x1ba   :  { %1629 = vtanh.f32 %v495_v49 }
 0x1bc   :  { %v695_v50 = vpop.f32.mrf.mxu2 }
 0x1bd   :  { %v1628_v51 = vpop.eup %1627  ;;  %v696_v52 = vadd.f32 %v2117_v18, %v695_v50 }
 0x1be   :  { %1435 = vmatmul.msk.f32.gmra.mxu3 %vm314_vm2, %v1628_v51  ;;  %v1061_v51 = vld [vmem:[%s2474_s4 + $0x8] sm:$0xff] }
 0x1bf   :  { %1631 = vtanh.f32 %v696_v52  ;;  %v497_v53 = vpop.f32.mrf.mxu1  ;;  %1182 = vmatpush.msrb.mxu0 %v1061_v51  ;;  %1504 = vmatpush.msra.mxu3 %v1061_v51 }
 0x1c0   :  { %v1630_v54 = vpop.eup %1629  ;;  %v498_v55 = vadd.f32 %v2022_v39, %v497_v53 }
 0x1c1   :  { %1413 = vmatmul.msk.f32.gmra.mxu2 %vm314_vm2, %v1630_v54 }
 0x1c2   :  { %1633 = vtanh.f32 %v498_v55 }
 0x1c4   :  { %v698_v56 = vpop.f32.mrf.mxu2 }
 0x1c5   :  { %v1632_v57 = vpop.eup %1631  ;;  %v699_v58 = vadd.f32 %v2117_v18, %v698_v56 }
 0x1c6   :  { %1436 = vmatmul.msk.f32.gmra.mxu3 %vm314_vm2, %v1632_v57 }
 0x1c7   :  { %1635 = vtanh.f32 %v699_v58  ;;  %v500_v59 = vpop.f32.mrf.mxu1 }
 0x1c8   :  { %v1634_v60 = vpop.eup %1633  ;;  %v501_v61 = vadd.f32 %v2022_v39, %v500_v59 }
 0x1c9   :  { %1414 = vmatmul.msk.f32.gmra.mxu2 %vm314_vm2, %v1634_v60 }
 0x1ca   :  { %1637 = vtanh.f32 %v501_v61 }
 0x1cc   :  { %v701_v62 = vpop.f32.mrf.mxu2 }
 0x1cd   :  { %v1636_v63 = vpop.eup %1635  ;;  %v702_v0 = vadd.f32 %v2117_v18, %v701_v62  ;;  %v2210_v62 = vld [vmem:[%s2472_s2 + $0x3] ss:$0 sm:$0xff] }
 0x1ce   :  { %1437 = vmatmul.msk.f32.gmra.mxu3 %vm314_vm2, %v1636_v63 }
 0x1cf   :  { %1639 = vtanh.f32 %v702_v0  ;;  %v503_v1 = vpop.f32.mrf.mxu1 }
 0x1d0   :  { %v1638_v2 = vpop.eup %1637  ;;  %v504_v3 = vadd.f32 %v2022_v39, %v503_v1 }
 0x1d1   :  { %1415 = vmatmul.msk.f32.gmra.mxu2 %vm314_vm2, %v1638_v2 }
 0x1d2   :  { %1641 = vtanh.f32 %v504_v3 }
 0x1d4   :  { %v704_v5 = vpop.f32.mrf.mxu2 }
 0x1d5   :  { %v1640_v6 = vpop.eup %1639  ;;  %v705_v7 = vadd.f32 %v2117_v18, %v704_v5 }
 0x1d6   :  { %1438 = vmatmul.msk.f32.gmra.mxu3 %vm314_vm2, %v1640_v6 }
 0x1d7   :  { %1643 = vtanh.f32 %v705_v7  ;;  %v506_v8 = vpop.f32.mrf.mxu1 }
 0x1d8   :  { %v1642_v9 = vpop.eup %1641  ;;  %v507_v10 = vadd.f32 %v2022_v39, %v506_v8 }
 0x1d9   :  { %1416 = vmatmul.msk.f32.gmra.mxu2 %vm314_vm2, %v1642_v9 }
 0x1da   :  { %1645 = vtanh.f32 %v507_v10 }
 0x1dc   :  { %v707_v30 = vpop.f32.mrf.mxu2 }
 0x1dd   :  { %v1644_v12 = vpop.eup %1643  ;;  %v708_v13 = vadd.f32 %v2117_v18, %v707_v30 }
 0x1de   :  { %1439 = vmatmul.msk.f32.gmra.mxu3 %vm314_vm2, %v1644_v12 }
 0x1df   :  { %1647 = vtanh.f32 %v708_v13  ;;  %v509_v14 = vpop.f32.mrf.mxu1 }
 0x1e0   :  { %v1646_v15 = vpop.eup %1645  ;;  %v510_v16 = vadd.f32 %v2022_v39, %v509_v14 }
 0x1e1   :  { %1417 = vmatmul.msk.f32.gmra.mxu2 %vm314_vm2, %v1646_v15 }
 0x1e2   :  { %1649 = vtanh.f32 %v510_v16 }
 0x1e4   :  { %v710_v19 = vpop.f32.mrf.mxu2 }
 0x1e5   :  { %v1648_v20 = vpop.eup %1647  ;;  %v711_v21 = vadd.f32 %v2117_v18, %v710_v19 }
 0x1e6   :  { %1440 = vmatmul.msk.f32.gmra.mxu3 %vm314_vm2, %v1648_v20 }
 0x1e7   :  { %1651 = vtanh.f32 %v711_v21  ;;  %v512_v22 = vpop.f32.mrf.mxu1 }
 0x1e8   :  { %v1650_v23 = vpop.eup %1649  ;;  %v513_v24 = vadd.f32 %v2022_v39, %v512_v22 }
 0x1e9   :  { %1418 = vmatmul.msk.f32.gmra.mxu2 %vm314_vm2, %v1650_v23 }
 0x1ea   :  { %1653 = vtanh.f32 %v513_v24 }
 0x1ec   :  { %v713_v25 = vpop.f32.mrf.mxu2 }
 0x1ed   :  { %v1652_v26 = vpop.eup %1651  ;;  %v714_v27 = vadd.f32 %v2117_v18, %v713_v25 }
 0x1ee   :  { %1441 = vmatmul.msk.f32.gmra.mxu3 %vm314_vm2, %v1652_v26 }
 0x1ef   :  { %1655 = vtanh.f32 %v714_v27  ;;  %v515_v28 = vpop.f32.mrf.mxu1 }
 0x1f0   :  { %v1654_v31 = vpop.eup %1653  ;;  %v516_v32 = vadd.f32 %v2022_v39, %v515_v28 }
 0x1f1   :  { %1419 = vmatmul.msk.f32.gmra.mxu2 %vm314_vm2, %v1654_v31 }
 0x1f2   :  { %1657 = vtanh.f32 %v516_v32 }
 0x1f4   :  { %v716_v33 = vpop.f32.mrf.mxu2 }
 0x1f5   :  { %v1656_v34 = vpop.eup %1655  ;;  %v717_v35 = vadd.f32 %v2117_v18, %v716_v33 }
 0x1f6   :  { %1442 = vmatmul.msk.f32.gmra.mxu3 %vm314_vm2, %v1656_v34 }
 0x1f7   :  { %1659 = vtanh.f32 %v717_v35  ;;  %v518_v36 = vpop.f32.mrf.mxu1 }
 0x1f8   :  { %v1658_v38 = vpop.eup %1657  ;;  %v519_v40 = vadd.f32 %v2022_v39, %v518_v36 }
 0x1f9   :  { %1420 = vmatmul.msk.f32.gmra.mxu2 %vm314_vm2, %v1658_v38 }
 0x1fa   :  { %1661 = vtanh.f32 %v519_v40 }
 0x1fc   :  { %v719_v41 = vpop.f32.mrf.mxu2 }
 0x1fd   :  { %v1660_v42 = vpop.eup %1659  ;;  %v720_v43 = vadd.f32 %v2117_v18, %v719_v41 }
 0x1fe   :  { %1443 = vmatmul.msk.f32.gmra.mxu3 %vm314_vm2, %v1660_v42 }
 0x1ff   :  { %1663 = vtanh.f32 %v720_v43  ;;  %v521_v44 = vpop.f32.mrf.mxu1 }
 0x200   :  { %v1662_v46 = vpop.eup %1661  ;;  %v522_v47 = vadd.f32 %v2022_v39, %v521_v44  ;;  %v1060_v39 = vld [vmem:[%s2474_s4] sm:$0xff] }
 0x201   :  { %1421 = vmatmul.msk.f32.gmra.mxu2 %vm314_vm2, %v1662_v46  ;;  %1183 = vmatpush.msrb.mxu0 %v1060_v39 }
 0x202   :  { %1665 = vtanh.f32 %v522_v47  ;;  %1505 = vmatpush.msra.mxu3 %v1060_v39 }
 0x204   :  { %v722_v48 = vpop.f32.mrf.mxu2 }
 0x205   :  { %v1664_v49 = vpop.eup %1663  ;;  %v723_v50 = vadd.f32 %v2117_v18, %v722_v48 }
 0x206   :  { %1444 = vmatmul.msk.f32.gmra.mxu3 %vm314_vm2, %v1664_v49 }
 0x207   :  { %1667 = vtanh.f32 %v723_v50 }
 0x208   :  { %v1666_v52 = vpop.eup %1665 }
 0x209   :  { %1422 = vmatmul.msk.f32.gmra.mxu2 %vm314_vm2, %v1666_v52 }
 0x20c   :  { %v725_v53 = vpop.f32.mrf.mxu2 }
 0x20d   :  { %v1668_v54 = vpop.eup %1667  ;;  %v726_v55 = vadd.f32 %v2117_v18, %v725_v53 }
 0x20e   :  { %1445 = vmatmul.msk.f32.gmra.mxu3 %vm314_vm2, %v1668_v54 }
 0x20f   :  { %1669 = vtanh.f32 %v726_v55 }
 0x214   :  { %v728_v56 = vpop.f32.mrf.mxu2 }
 0x215   :  { %v1670_v57 = vpop.eup %1669  ;;  %v729_v58 = vadd.f32 %v2117_v18, %v728_v56 }
 0x216   :  { %1446 = vmatmul.msk.f32.gmra.mxu3 %vm314_vm2, %v1670_v57 }
 0x217   :  { %1671 = vtanh.f32 %v729_v58 }
 0x21c   :  { %v731_v59 = vpop.f32.mrf.mxu2 }
 0x21d   :  { %v1672_v60 = vpop.eup %1671  ;;  %v732_v61 = vadd.f32 %v2117_v18, %v731_v59 }
 0x21e   :  { %1447 = vmatmul.msk.f32.gmra.mxu3 %vm314_vm2, %v1672_v60 }
 0x21f   :  { %1673 = vtanh.f32 %v732_v61 }
 0x221   :  { %v932_v63 = vpop.f32.mrf.mxu3 }
 0x222   :  { %v933_v0 = vadd.f32 %v2210_v62, %v932_v63 }
 0x224   :  { %1675 = vtanh.f32 %v933_v0  ;;  %v734_v1 = vpop.f32.mrf.mxu2 }
 0x225   :  { %v1674_v2 = vpop.eup %1673  ;;  %v735_v3 = vadd.f32 %v2117_v18, %v734_v1 }
 0x226   :  { %1448 = vmatmul.msk.f32.gmra.mxu3 %vm314_vm2, %v1674_v2 }
 0x227   :  { %1677 = vtanh.f32 %v735_v3 }
 0x229   :  { %v935_v4 = vpop.f32.mrf.mxu3 }
 0x22a   :  { %v1676_v5 = vpop.eup %1675  ;;  %v936_v6 = vadd.f32 %v2210_v62, %v935_v4 }
 0x22b   :  { %1463 = vmatmul.msk.f32.vlgmr.msrb.gmra.mxu0 %vm314_vm2, %v1676_v5 }
 0x22c   :  { %1679 = vtanh.f32 %v936_v6  ;;  %v737_v7 = vpop.f32.mrf.mxu2 }
 0x22d   :  { %v1678_v8 = vpop.eup %1677  ;;  %v738_v9 = vadd.f32 %v2117_v18, %v737_v7 }
 0x22e   :  { %1449 = vmatmul.msk.f32.gmra.mxu3 %vm314_vm2, %v1678_v8 }
 0x22f   :  { %1681 = vtanh.f32 %v738_v9 }
 0x231   :  { %v938_v10 = vpop.f32.mrf.mxu3 }
 0x232   :  { %v1680_v11 = vpop.eup %1679  ;;  %v939_v30 = vadd.f32 %v2210_v62, %v938_v10 }
 0x233   :  { %1464 = vmatmul.msk.f32.gmra.mxu0 %vm314_vm2, %v1680_v11 }
 0x234   :  { %1683 = vtanh.f32 %v939_v30  ;;  %v740_v12 = vpop.f32.mrf.mxu2 }
 0x235   :  { %v1682_v13 = vpop.eup %1681  ;;  %v741_v14 = vadd.f32 %v2117_v18, %v740_v12 }
 0x236   :  { %1450 = vmatmul.msk.f32.gmra.mxu3 %vm314_vm2, %v1682_v13 }
 0x237   :  { %1685 = vtanh.f32 %v741_v14 }
 0x239   :  { %v941_v15 = vpop.f32.mrf.mxu3 }
 0x23a   :  { %v1684_v16 = vpop.eup %1683  ;;  %v942_v17 = vadd.f32 %v2210_v62, %v941_v15 }
 0x23b   :  { %1465 = vmatmul.msk.f32.gmra.mxu0 %vm314_vm2, %v1684_v16 }
 0x23c   :  { %1687 = vtanh.f32 %v942_v17  ;;  %v743_v19 = vpop.f32.mrf.mxu2 }
 0x23d   :  { %v1686_v20 = vpop.eup %1685  ;;  %v744_v21 = vadd.f32 %v2117_v18, %v743_v19 }
 0x23e   :  { %1451 = vmatmul.msk.f32.gmra.mxu3 %vm314_vm2, %v1686_v20 }
 0x23f   :  { %1689 = vtanh.f32 %v744_v21 }
 0x241   :  { %v944_v22 = vpop.f32.mrf.mxu3 }
 0x242   :  { %v1688_v23 = vpop.eup %1687  ;;  %v945_v24 = vadd.f32 %v2210_v62, %v944_v22 }
 0x243   :  { %1466 = vmatmul.msk.f32.gmra.mxu0 %vm314_vm2, %v1688_v23 }
 0x244   :  { %1691 = vtanh.f32 %v945_v24  ;;  %v746_v25 = vpop.f32.mrf.mxu2 }
 0x245   :  { %v1690_v26 = vpop.eup %1689  ;;  %v747_v27 = vadd.f32 %v2117_v18, %v746_v25 }
 0x246   :  { %1452 = vmatmul.msk.f32.gmra.mxu3 %vm314_vm2, %v1690_v26 }
 0x247   :  { %1693 = vtanh.f32 %v747_v27 }
 0x249   :  { %v947_v28 = vpop.f32.mrf.mxu3 }
 0x24a   :  { %v1692_v29 = vpop.eup %1691  ;;  %v948_v31 = vadd.f32 %v2210_v62, %v947_v28 }
 0x24b   :  { %1467 = vmatmul.msk.f32.gmra.mxu0 %vm314_vm2, %v1692_v29  ;;  %v2277_v29 = vld [vmem:[%s2475_s5] ss:$0 sm:$0xff] }
 0x24c   :  { %1695 = vtanh.f32 %v948_v31  ;;  %v749_v32 = vpop.f32.mrf.mxu2 }
 0x24d   :  { %v1694_v33 = vpop.eup %1693  ;;  %v750_v34 = vadd.f32 %v2117_v18, %v749_v32 }
 0x24e   :  { %1453 = vmatmul.msk.f32.gmra.mxu3 %vm314_vm2, %v1694_v33 }
 0x24f   :  { %1697 = vtanh.f32 %v750_v34 }
 0x251   :  { %v950_v35 = vpop.f32.mrf.mxu3 }
 0x252   :  { %v1696_v36 = vpop.eup %1695  ;;  %v951_v37 = vadd.f32 %v2210_v62, %v950_v35 }
 0x253   :  { %1468 = vmatmul.msk.f32.gmra.mxu0 %vm314_vm2, %v1696_v36 }
 0x254   :  { %1699 = vtanh.f32 %v951_v37  ;;  %v752_v38 = vpop.f32.mrf.mxu2 }
 0x255   :  { %v1698_v40 = vpop.eup %1697  ;;  %v753_v41 = vadd.f32 %v2117_v18, %v752_v38 }
 0x256   :  { %1454 = vmatmul.msk.f32.gmra.mxu3 %vm314_vm2, %v1698_v40 }
 0x257   :  { %1701 = vtanh.f32 %v753_v41 }
 0x259   :  { %v953_v42 = vpop.f32.mrf.mxu3 }
 0x25a   :  { %v1700_v43 = vpop.eup %1699  ;;  %v954_v44 = vadd.f32 %v2210_v62, %v953_v42 }
 0x25b   :  { %1469 = vmatmul.msk.f32.gmra.mxu0 %vm314_vm2, %v1700_v43 }
 0x25c   :  { %1703 = vtanh.f32 %v954_v44  ;;  %v755_v45 = vpop.f32.mrf.mxu2 }
 0x25d   :  { %v1702_v46 = vpop.eup %1701  ;;  %v756_v47 = vadd.f32 %v2117_v18, %v755_v45 }
 0x25e   :  { %1455 = vmatmul.msk.f32.gmra.mxu3 %vm314_vm2, %v1702_v46 }
 0x25f   :  { %1705 = vtanh.f32 %v756_v47 }
 0x261   :  { %v956_v48 = vpop.f32.mrf.mxu3 }
 0x262   :  { %v1704_v49 = vpop.eup %1703  ;;  %v957_v50 = vadd.f32 %v2210_v62, %v956_v48 }
 0x263   :  { %1470 = vmatmul.msk.f32.gmra.mxu0 %vm314_vm2, %v1704_v49 }
 0x264   :  { %1707 = vtanh.f32 %v957_v50  ;;  %v758_v51 = vpop.f32.mrf.mxu2 }
 0x265   :  { %v1706_v52 = vpop.eup %1705  ;;  %v759_v39 = vadd.f32 %v2117_v18, %v758_v51 }
 0x266   :  { %1456 = vmatmul.msk.f32.gmra.mxu3 %vm314_vm2, %v1706_v52 }
 0x267   :  { %1709 = vtanh.f32 %v759_v39 }
 0x269   :  { %v959_v53 = vpop.f32.mrf.mxu3 }
 0x26a   :  { %v1708_v54 = vpop.eup %1707  ;;  %v960_v55 = vadd.f32 %v2210_v62, %v959_v53 }
 0x26b   :  { %1471 = vmatmul.msk.f32.gmra.mxu0 %vm314_vm2, %v1708_v54 }
 0x26c   :  { %1711 = vtanh.f32 %v960_v55  ;;  %v761_v56 = vpop.f32.mrf.mxu2 }
 0x26d   :  { %v1710_v57 = vpop.eup %1709  ;;  %v762_v58 = vadd.f32 %v2117_v18, %v761_v56 }
 0x26e   :  { %1457 = vmatmul.msk.f32.gmra.mxu3 %vm314_vm2, %v1710_v57 }
 0x26f   :  { %1713 = vtanh.f32 %v762_v58 }
 0x271   :  { %v962_v59 = vpop.f32.mrf.mxu3 }
 0x272   :  { %v1712_v60 = vpop.eup %1711  ;;  %v963_v61 = vadd.f32 %v2210_v62, %v962_v59 }
 0x273   :  { %1472 = vmatmul.msk.f32.gmra.mxu0 %vm314_vm2, %v1712_v60 }
 0x274   :  { %1715 = vtanh.f32 %v963_v61  ;;  %v764_v63 = vpop.f32.mrf.mxu2 }
 0x275   :  { %v1714_v0 = vpop.eup %1713  ;;  %v765_v1 = vadd.f32 %v2117_v18, %v764_v63 }
 0x276   :  { %1458 = vmatmul.msk.f32.gmra.mxu3 %vm314_vm2, %v1714_v0 }
 0x277   :  { %1717 = vtanh.f32 %v765_v1 }
 0x279   :  { %v965_v2 = vpop.f32.mrf.mxu3 }
 0x27a   :  { %v1716_v3 = vpop.eup %1715  ;;  %v966_v4 = vadd.f32 %v2210_v62, %v965_v2 }
 0x27b   :  { %1473 = vmatmul.msk.f32.gmra.mxu0 %vm314_vm2, %v1716_v3 }
 0x27c   :  { %1719 = vtanh.f32 %v966_v4  ;;  %v767_v5 = vpop.f32.mrf.mxu2 }
 0x27d   :  { %v1718_v6 = vpop.eup %1717  ;;  %v768_v7 = vadd.f32 %v2117_v18, %v767_v5 }
 0x27e   :  { %1459 = vmatmul.msk.f32.gmra.mxu3 %vm314_vm2, %v1718_v6 }
 0x27f   :  { %1721 = vtanh.f32 %v768_v7 }
 0x281   :  { %v968_v8 = vpop.f32.mrf.mxu3 }
 0x282   :  { %v1720_v9 = vpop.eup %1719  ;;  %v969_v10 = vadd.f32 %v2210_v62, %v968_v8 }
 0x283   :  { %1474 = vmatmul.msk.f32.gmra.mxu0 %vm314_vm2, %v1720_v9 }
 0x284   :  { %1723 = vtanh.f32 %v969_v10  ;;  %v770_v11 = vpop.f32.mrf.mxu2 }
 0x285   :  { %v1722_v30 = vpop.eup %1721  ;;  %v771_v12 = vadd.f32 %v2117_v18, %v770_v11 }
 0x286   :  { %1460 = vmatmul.msk.f32.gmra.mxu3 %vm314_vm2, %v1722_v30 }
 0x287   :  { %1725 = vtanh.f32 %v771_v12 }
 0x289   :  { %v971_v13 = vpop.f32.mrf.mxu3 }
 0x28a   :  { %v1724_v14 = vpop.eup %1723  ;;  %v972_v15 = vadd.f32 %v2210_v62, %v971_v13 }
 0x28b   :  { %1475 = vmatmul.msk.f32.gmra.mxu0 %vm314_vm2, %v1724_v14 }
 0x28c   :  { %1727 = vtanh.f32 %v972_v15  ;;  %v773_v16 = vpop.f32.mrf.mxu2 }
 0x28d   :  { %v1726_v17 = vpop.eup %1725  ;;  %v774_v19 = vadd.f32 %v2117_v18, %v773_v16 }
 0x28e   :  { %1461 = vmatmul.msk.f32.gmra.mxu3 %vm314_vm2, %v1726_v17 }
 0x28f   :  { %1729 = vtanh.f32 %v774_v19 }
 0x291   :  { %v974_v20 = vpop.f32.mrf.mxu3 }
 0x292   :  { %v1728_v21 = vpop.eup %1727  ;;  %v975_v22 = vadd.f32 %v2210_v62, %v974_v20 }
 0x293   :  { %1476 = vmatmul.msk.f32.gmra.mxu0 %vm314_vm2, %v1728_v21 }
 0x294   :  { %1731 = vtanh.f32 %v975_v22 }
 0x295   :  { %v1730_v23 = vpop.eup %1729 }
 0x296   :  { %1462 = vmatmul.msk.f32.gmra.mxu3 %vm314_vm2, %v1730_v23 }
 0x299   :  { %v977_v24 = vpop.f32.mrf.mxu3 }
 0x29a   :  { %v1732_v25 = vpop.eup %1731  ;;  %v978_v26 = vadd.f32 %v2210_v62, %v977_v24 }
 0x29b   :  { %1477 = vmatmul.msk.f32.gmra.mxu0 %vm314_vm2, %v1732_v25 }
 0x29c   :  { %1733 = vtanh.f32 %v978_v26 }
 0x2a1   :  { %v980_v18 = vpop.f32.mrf.mxu3 }
 0x2a2   :  { %v1734_v27 = vpop.eup %1733  ;;  %v981_v28 = vadd.f32 %v2210_v62, %v980_v18 }
 0x2a3   :  { %1478 = vmatmul.msk.f32.gmra.mxu0 %vm314_vm2, %v1734_v27 }
 0x2a4   :  { %1735 = vtanh.f32 %v981_v28 }
 0x2a8   :  { %v1185_v31 = vpop.f32.mrf.mxu0 }
 0x2a9   :  { %v1186_v32 = vadd.f32 %v2277_v29, %v1185_v31  ;;  %v983_v33 = vpop.f32.mrf.mxu3 }
 0x2aa   :  { %v1736_v34 = vpop.eup %1735  ;;  %v984_v35 = vadd.f32 %v2210_v62, %v983_v33 }
 0x2ab   :  { %1282 = vst.msk [vmem:[%s2476_s6] sm:$0xff] %vm1281_vm3, %v1186_v32  ;;  %1479 = vmatmul.msk.f32.gmra.mxu0 %vm314_vm2, %v1736_v34 }
 0x2ac   :  { %1737 = vtanh.f32 %v984_v35 }
 0x2b0   :  { %v1188_v36 = vpop.f32.mrf.mxu0 }
 0x2b1   :  { %v1189_v37 = vadd.f32 %v2277_v29, %v1188_v36  ;;  %v986_v38 = vpop.f32.mrf.mxu3 }
 0x2b2   :  { %v1738_v40 = vpop.eup %1737  ;;  %v987_v41 = vadd.f32 %v2210_v62, %v986_v38 }
 0x2b3   :  { %1283 = vst.msk [vmem:[%s2476_s6 + $0x8] sm:$0xff] %vm1281_vm3, %v1189_v37  ;;  %1480 = vmatmul.msk.f32.gmra.mxu0 %vm314_vm2, %v1738_v40 }
 0x2b4   :  { %1739 = vtanh.f32 %v987_v41 }
 0x2b8   :  { %v1191_v42 = vpop.f32.mrf.mxu0 }
 0x2b9   :  { %v1192_v43 = vadd.f32 %v2277_v29, %v1191_v42  ;;  %v989_v44 = vpop.f32.mrf.mxu3 }
 0x2ba   :  { %v1740_v45 = vpop.eup %1739  ;;  %v990_v46 = vadd.f32 %v2210_v62, %v989_v44 }
 0x2bb   :  { %1284 = vst.msk [vmem:[%s2476_s6 + $0x10] sm:$0xff] %vm1281_vm3, %v1192_v43  ;;  %1481 = vmatmul.msk.f32.gmra.mxu0 %vm314_vm2, %v1740_v45 }
 0x2bc   :  { %1741 = vtanh.f32 %v990_v46 }
 0x2c0   :  { %v1194_v47 = vpop.f32.mrf.mxu0 }
 0x2c1   :  { %v1195_v48 = vadd.f32 %v2277_v29, %v1194_v47  ;;  %v992_v49 = vpop.f32.mrf.mxu3 }
 0x2c2   :  { %v1742_v50 = vpop.eup %1741  ;;  %v993_v51 = vadd.f32 %v2210_v62, %v992_v49 }
 0x2c3   :  { %1285 = vst.msk [vmem:[%s2476_s6 + $0x18] sm:$0xff] %vm1281_vm3, %v1195_v48  ;;  %1482 = vmatmul.msk.f32.gmra.mxu0 %vm314_vm2, %v1742_v50 }
 0x2c4   :  { %1743 = vtanh.f32 %v993_v51 }
 0x2c8   :  { %v1197_v52 = vpop.f32.mrf.mxu0 }
 0x2c9   :  { %v1198_v39 = vadd.f32 %v2277_v29, %v1197_v52  ;;  %v995_v53 = vpop.f32.mrf.mxu3 }
 0x2ca   :  { %v1744_v54 = vpop.eup %1743  ;;  %v996_v55 = vadd.f32 %v2210_v62, %v995_v53 }
 0x2cb   :  { %1286 = vst.msk [vmem:[%s2476_s6 + $0x20] sm:$0xff] %vm1281_vm3, %v1198_v39  ;;  %1483 = vmatmul.msk.f32.gmra.mxu0 %vm314_vm2, %v1744_v54 }
 0x2cc   :  { %1745 = vtanh.f32 %v996_v55 }
 0x2d0   :  { %v1200_v56 = vpop.f32.mrf.mxu0 }
 0x2d1   :  { %v1201_v57 = vadd.f32 %v2277_v29, %v1200_v56  ;;  %v998_v58 = vpop.f32.mrf.mxu3 }
 0x2d2   :  { %v1746_v59 = vpop.eup %1745  ;;  %v999_v60 = vadd.f32 %v2210_v62, %v998_v58 }
 0x2d3   :  { %1287 = vst.msk [vmem:[%s2476_s6 + $0x28] sm:$0xff] %vm1281_vm3, %v1201_v57  ;;  %1484 = vmatmul.msk.f32.gmra.mxu0 %vm314_vm2, %v1746_v59 }
 0x2d4   :  { %1747 = vtanh.f32 %v999_v60 }
 0x2d8   :  { %v1203_v61 = vpop.f32.mrf.mxu0 }
 0x2d9   :  { %v1204_v63 = vadd.f32 %v2277_v29, %v1203_v61  ;;  %v1001_v0 = vpop.f32.mrf.mxu3 }
 0x2da   :  { %v1748_v1 = vpop.eup %1747  ;;  %v1002_v2 = vadd.f32 %v2210_v62, %v1001_v0 }
 0x2db   :  { %1288 = vst.msk [vmem:[%s2476_s6 + $0x30] sm:$0xff] %vm1281_vm3, %v1204_v63  ;;  %1485 = vmatmul.msk.f32.gmra.mxu0 %vm314_vm2, %v1748_v1 }
 0x2dc   :  { %1749 = vtanh.f32 %v1002_v2 }
 0x2e0   :  { %v1206_v3 = vpop.f32.mrf.mxu0 }
 0x2e1   :  { %v1207_v4 = vadd.f32 %v2277_v29, %v1206_v3  ;;  %v1004_v5 = vpop.f32.mrf.mxu3 }
 0x2e2   :  { %v1750_v6 = vpop.eup %1749  ;;  %v1005_v7 = vadd.f32 %v2210_v62, %v1004_v5 }
 0x2e3   :  { %1289 = vst.msk [vmem:[%s2476_s6 + $0x38] sm:$0xff] %vm1281_vm3, %v1207_v4  ;;  %1486 = vmatmul.msk.f32.gmra.mxu0 %vm314_vm2, %v1750_v6 }
 0x2e4   :  { %1751 = vtanh.f32 %v1005_v7 }
 0x2e8   :  { %v1209_v8 = vpop.f32.mrf.mxu0 }
 0x2e9   :  { %v1210_v9 = vadd.f32 %v2277_v29, %v1209_v8  ;;  %v1007_v10 = vpop.f32.mrf.mxu3 }
 0x2ea   :  { %v1752_v11 = vpop.eup %1751  ;;  %v1008_v30 = vadd.f32 %v2210_v62, %v1007_v10 }
 0x2eb   :  { %1290 = vst.msk [vmem:[%s2476_s6 + $0x40] sm:$0xff] %vm1281_vm3, %v1210_v9  ;;  %1487 = vmatmul.msk.f32.gmra.mxu0 %vm314_vm2, %v1752_v11 }
 0x2ec   :  { %1753 = vtanh.f32 %v1008_v30 }
 0x2f0   :  { %v1212_v12 = vpop.f32.mrf.mxu0 }
 0x2f1   :  { %v1213_v13 = vadd.f32 %v2277_v29, %v1212_v12  ;;  %v1010_v14 = vpop.f32.mrf.mxu3 }
 0x2f2   :  { %v1754_v15 = vpop.eup %1753  ;;  %v1011_v16 = vadd.f32 %v2210_v62, %v1010_v14 }
 0x2f3   :  { %1291 = vst.msk [vmem:[%s2476_s6 + $0x48] sm:$0xff] %vm1281_vm3, %v1213_v13  ;;  %1488 = vmatmul.msk.f32.gmra.mxu0 %vm314_vm2, %v1754_v15 }
 0x2f4   :  { %1755 = vtanh.f32 %v1011_v16 }
 0x2f8   :  { %v1215_v17 = vpop.f32.mrf.mxu0 }
 0x2f9   :  { %v1216_v19 = vadd.f32 %v2277_v29, %v1215_v17  ;;  %v1013_v20 = vpop.f32.mrf.mxu3 }
 0x2fa   :  { %v1756_v21 = vpop.eup %1755  ;;  %v1014_v22 = vadd.f32 %v2210_v62, %v1013_v20 }
 0x2fb   :  { %1292 = vst.msk [vmem:[%s2476_s6 + $0x50] sm:$0xff] %vm1281_vm3, %v1216_v19  ;;  %1489 = vmatmul.msk.f32.gmra.mxu0 %vm314_vm2, %v1756_v21 }
 0x2fc   :  { %1757 = vtanh.f32 %v1014_v22 }
 0x300   :  { %v1218_v23 = vpop.f32.mrf.mxu0 }
 0x301   :  { %v1219_v24 = vadd.f32 %v2277_v29, %v1218_v23  ;;  %v1016_v25 = vpop.f32.mrf.mxu3 }
 0x302   :  { %v1758_v26 = vpop.eup %1757  ;;  %v1017_v18 = vadd.f32 %v2210_v62, %v1016_v25 }
 0x303   :  { %1293 = vst.msk [vmem:[%s2476_s6 + $0x58] sm:$0xff] %vm1281_vm3, %v1219_v24  ;;  %1490 = vmatmul.msk.f32.gmra.mxu0 %vm314_vm2, %v1758_v26 }
 0x304   :  { %1759 = vtanh.f32 %v1017_v18 }
 0x308   :  { %v1221_v27 = vpop.f32.mrf.mxu0 }
 0x309   :  { %v1222_v28 = vadd.f32 %v2277_v29, %v1221_v27  ;;  %v1019_v31 = vpop.f32.mrf.mxu3 }
 0x30a   :  { %v1760_v32 = vpop.eup %1759  ;;  %v1020_v33 = vadd.f32 %v2210_v62, %v1019_v31 }
 0x30b   :  { %1294 = vst.msk [vmem:[%s2476_s6 + $0x60] sm:$0xff] %vm1281_vm3, %v1222_v28  ;;  %1491 = vmatmul.msk.f32.gmra.mxu0 %vm314_vm2, %v1760_v32 }
 0x30c   :  { %1761 = vtanh.f32 %v1020_v33 }
 0x310   :  { %v1224_v34 = vpop.f32.mrf.mxu0 }
 0x311   :  { %v1225_v35 = vadd.f32 %v2277_v29, %v1224_v34  ;;  %v1022_v36 = vpop.f32.mrf.mxu3 }
 0x312   :  { %v1762_v37 = vpop.eup %1761  ;;  %v1023_v38 = vadd.f32 %v2210_v62, %v1022_v36 }
 0x313   :  { %1295 = vst.msk [vmem:[%s2476_s6 + $0x68] sm:$0xff] %vm1281_vm3, %v1225_v35  ;;  %1492 = vmatmul.msk.f32.gmra.mxu0 %vm314_vm2, %v1762_v37 }
 0x314   :  { %1763 = vtanh.f32 %v1023_v38 }
 0x318   :  { %v1227_v40 = vpop.f32.mrf.mxu0 }
 0x319   :  { %v1228_v41 = vadd.f32 %v2277_v29, %v1227_v40  ;;  %v1025_v42 = vpop.f32.mrf.mxu3 }
 0x31a   :  { %v1764_v43 = vpop.eup %1763  ;;  %v1026_v44 = vadd.f32 %v2210_v62, %v1025_v42 }
 0x31b   :  { %1296 = vst.msk [vmem:[%s2476_s6 + $0x70] sm:$0xff] %vm1281_vm3, %v1228_v41  ;;  %1493 = vmatmul.msk.f32.gmra.mxu0 %vm314_vm2, %v1764_v43 }
 0x31c   :  { %1765 = vtanh.f32 %v1026_v44 }
 0x320   :  { %v1230_v45 = vpop.f32.mrf.mxu0 }
 0x321   :  { %v1231_v46 = vadd.f32 %v2277_v29, %v1230_v45 }
 0x322   :  { %v1766_v47 = vpop.eup %1765 }
 0x323   :  { %1297 = vst.msk [vmem:[%s2476_s6 + $0x78] sm:$0xff] %vm1281_vm3, %v1231_v46  ;;  %1494 = vmatmul.msk.f32.vlgmr.msra.gmra.mxu3 %vm314_vm2, %v1766_v47 }
 0x328   :  { %v1233_v62 = vpop.f32.mrf.mxu0 }
 0x329   :  { %v1234_v48 = vadd.f32 %v2277_v29, %v1233_v62 }
 0x32b   :  { %1298 = vst.msk [vmem:[%s2476_s6 + $0x80] sm:$0xff] %vm1281_vm3, %v1234_v48 }
 0x330   :  { %v1236_v49 = vpop.f32.mrf.mxu0 }
 0x331   :  { %v1237_v50 = vadd.f32 %v2277_v29, %v1236_v49 }
 0x333   :  { %1299 = vst.msk [vmem:[%s2476_s6 + $0x88] sm:$0xff] %vm1281_vm3, %v1237_v50 }
 0x338   :  { %v1239_v51 = vpop.f32.mrf.mxu0 }
 0x339   :  { %v1240_v52 = vadd.f32 %v2277_v29, %v1239_v51 }
 0x33b   :  { %1300 = vst.msk [vmem:[%s2476_s6 + $0x90] sm:$0xff] %vm1281_vm3, %v1240_v52 }
 0x340   :  { %v1242_v39 = vpop.f32.mrf.mxu0 }
 0x341   :  { %v1243_v53 = vadd.f32 %v2277_v29, %v1242_v39 }
 0x343   :  { %1301 = vst.msk [vmem:[%s2476_s6 + $0x98] sm:$0xff] %vm1281_vm3, %v1243_v53 }
 0x348   :  { %v1245_v54 = vpop.f32.mrf.mxu0 }
 0x349   :  { %v1246_v55 = vadd.f32 %v2277_v29, %v1245_v54 }
 0x34b   :  { %1302 = vst.msk [vmem:[%s2476_s6 + $0xa0] sm:$0xff] %vm1281_vm3, %v1246_v55 }
 0x350   :  { %v1248_v56 = vpop.f32.mrf.mxu0 }
 0x351   :  { %v1249_v57 = vadd.f32 %v2277_v29, %v1248_v56 }
 0x353   :  { %1303 = vst.msk [vmem:[%s2476_s6 + $0xa8] sm:$0xff] %vm1281_vm3, %v1249_v57 }
 0x358   :  { %v1251_v58 = vpop.f32.mrf.mxu0 }
 0x359   :  { %v1252_v59 = vadd.f32 %v2277_v29, %v1251_v58 }
 0x35b   :  { %1304 = vst.msk [vmem:[%s2476_s6 + $0xb0] sm:$0xff] %vm1281_vm3, %v1252_v59 }
 0x360   :  { %v1254_v60 = vpop.f32.mrf.mxu0 }
 0x361   :  { %v1255_v61 = vadd.f32 %v2277_v29, %v1254_v60 }
 0x363   :  { %1305 = vst.msk [vmem:[%s2476_s6 + $0xb8] sm:$0xff] %vm1281_vm3, %v1255_v61 }
 0x368   :  { %v1257_v63 = vpop.f32.mrf.mxu0 }
 0x369   :  { %v1258_v0 = vadd.f32 %v2277_v29, %v1257_v63 }
 0x36b   :  { %1306 = vst.msk [vmem:[%s2476_s6 + $0xc0] sm:$0xff] %vm1281_vm3, %v1258_v0 }
 0x370   :  { %v1260_v1 = vpop.f32.mrf.mxu0 }
 0x371   :  { %v1261_v2 = vadd.f32 %v2277_v29, %v1260_v1 }
 0x373   :  { %1307 = vst.msk [vmem:[%s2476_s6 + $0xc8] sm:$0xff] %vm1281_vm3, %v1261_v2 }
 0x378   :  { %v1263_v3 = vpop.f32.mrf.mxu0 }
 0x379   :  { %v1264_v4 = vadd.f32 %v2277_v29, %v1263_v3 }
 0x37b   :  { %1308 = vst.msk [vmem:[%s2476_s6 + $0xd0] sm:$0xff] %vm1281_vm3, %v1264_v4 }
 0x380   :  { %v1266_v5 = vpop.f32.mrf.mxu0 }
 0x381   :  { %v1267_v6 = vadd.f32 %v2277_v29, %v1266_v5 }
 0x383   :  { %1309 = vst.msk [vmem:[%s2476_s6 + $0xd8] sm:$0xff] %vm1281_vm3, %v1267_v6 }
 0x388   :  { %v1269_v7 = vpop.f32.mrf.mxu0 }
 0x389   :  { %v1270_v8 = vadd.f32 %v2277_v29, %v1269_v7 }
 0x38b   :  { %1310 = vst.msk [vmem:[%s2476_s6 + $0xe0] sm:$0xff] %vm1281_vm3, %v1270_v8 }
 0x390   :  { %v1272_v9 = vpop.f32.mrf.mxu0 }
 0x391   :  { %v1273_v10 = vadd.f32 %v2277_v29, %v1272_v9 }
 0x393   :  { %1311 = vst.msk [vmem:[%s2476_s6 + $0xe8] sm:$0xff] %vm1281_vm3, %v1273_v10 }
 0x398   :  { %v1275_v11 = vpop.f32.mrf.mxu0 }
 0x399   :  { %v1276_v30 = vadd.f32 %v2277_v29, %v1275_v11 }
 0x39b   :  { %1312 = vst.msk [vmem:[%s2476_s6 + $0xf0] sm:$0xff] %vm1281_vm3, %v1276_v30 }
 0x3a6   :  { %v1278_v12 = vpop.f32.mrf.mxu3 }
 0x3a7   :  { %v1279_v13 = vadd.f32 %v2277_v29, %v1278_v12 }
 0x3a9   :  { %1313 = vst.msk [vmem:[%s2476_s6 + $0xf8] sm:$0xff] %vm1281_vm3, %v1279_v13 }

</bundles_post_ra>
